<compile_context>
chip_gen: v7x
topology: tpu7x:2x2x1
jax: 0.10.0
libtpu: 0.0.40
codegen_flags: <defaults>
</compile_context>

<pallas_src>
import jax
import jax.numpy as jnp
from jax.experimental import pallas as pl
from jax.experimental.pallas import tpu as pltpu


def _merge_ln_linear_kernel(x_ref, w_ref, b_ref, o_ref):
    """Fused (2x2 merge) -> LayerNorm(4C) -> Linear(4C -> 2C, bias=False).

    x_ref: (th, 2, wp, 2C)  dim 1 = image-row parity; the last axis packs
                            (column parity, C), so parity 0 carries [x0 | x2]
                            and parity 1 carries [x1 | x3].
    w_ref: (4C, Co)         reduction weight with LN gamma folded in, rows in
                            the kernel channel order [x0 | x2 | x1 | x3].
    b_ref: (1, Co)          beta @ W (LN shift pushed through the linear).
    o_ref: (th*wp, Co)
    """
    th, _, wp, two_c = x_ref.shape
    n = th * wp
    inv_4c = 1.0 / (2 * two_c)

    xb = x_ref[...]                                        # one dense block load
    xe = xb[:, 0].astype(jnp.float32).reshape(n, two_c)    # [x0 | x2]
    xo = xb[:, 1].astype(jnp.float32).reshape(n, two_c)    # [x1 | x3]

    # LayerNorm statistics over all 4C channels of each merged token (f32).
    mean = (jnp.sum(xe, axis=-1, keepdims=True)
            + jnp.sum(xo, axis=-1, keepdims=True)) * inv_4c
    ce = xe - mean
    co = xo - mean
    var = (jnp.sum(ce * ce, axis=-1, keepdims=True)
           + jnp.sum(co * co, axis=-1, keepdims=True)) * inv_4c
    inv = jax.lax.rsqrt(var + 1e-5)                 # torch LayerNorm default eps

    mm_dtype = w_ref.dtype
    w = w_ref[...]
    if two_c < 128:
        # Small channel count: one K=4C matmul beats two K=2C dots (each small
        # dot pads K up to the MXU depth and doubles result-FIFO traffic).
        cat = jnp.concatenate([ce, co], axis=-1).astype(mm_dtype)   # (n, 4C)
        acc = jnp.dot(cat, w, preferred_element_type=jnp.float32)
    else:
        acc = jnp.dot(ce.astype(mm_dtype), w[:two_c],
                      preferred_element_type=jnp.float32)
        acc = acc + jnp.dot(co.astype(mm_dtype), w[two_c:],
                            preferred_element_type=jnp.float32)
    # Per-token inverse-std folded in AFTER the matmul (per-row scalar).
    o_ref[...] = (acc * inv + b_ref[...]).astype(o_ref.dtype)


def _vmem_capacity_bytes():
    """Generation-aware VMEM capacity with a conservative (v7x) fallback."""
    try:
        cap = getattr(pltpu.get_tpu_info(), "vmem_capacity_bytes", None)
        if cap:
            return int(cap)
    except Exception:
        pass
    return 64 * 1024 * 1024


def patch_merging(x, H, W, gamma, beta, w_red, *,
                  target_block_tokens=2048,
                  matmul_dtype=jnp.bfloat16,
                  pad_narrow_output=True):
    """Swin PatchMerging forward.

    x     : (B, H*W, C)   float32 or bfloat16 (output dtype follows x)
    gamma : (4C,)         LayerNorm weight
    beta  : (4C,)         LayerNorm bias
    w_red : (4C, 2C)      reduction weight (torch nn.Linear(4C, 2C).weight.T)
    returns (B, ceil(H/2)*ceil(W/2), 2C)
    """
    B, L, C = x.shape
    assert L == H * W, "input feature has wrong size"

    hp, wp = (H + 1) // 2, (W + 1) // 2
    xv = x.reshape(B, H, W, C)
    if (H % 2) or (W % 2):
        # TODO(synk): fold this bottom/right zero pad into the kernel (masked
        # last block) to avoid an extra full HBM pass on the odd-size path.
        xv = jnp.pad(xv, ((0, 0), (0, H % 2), (0, W % 2), (0, 0)))
    # Free metadata reshape: (B*hp) rows of merged tokens; dim 1 = h parity;
    # the last axis packs (w parity, C) into 2C.
    xr = xv.reshape(B * hp, 2, wp, 2 * C)

    co = 2 * C
    # Lane-pad the output only when it is narrower than one vreg lane row
    # (2C < 128); real Swin dims (2C >= 128) are written unpadded -> no slice.
    pad_out = pad_narrow_output and co < 128
    co_out = 128 if pad_out else co

    # ---- fold the LayerNorm affine into the reduction weight (tiny arrays) ----
    w_g = gamma[:, None] * w_red                       # (4C, 2C)
    # torch channel order [x0|x1|x2|x3] -> kernel order [x0|x2|x1|x3]
    w_k = jnp.concatenate(
        [w_g[0:C], w_g[2 * C:3 * C], w_g[C:2 * C], w_g[3 * C:4 * C]], axis=0)
    bias = beta @ w_red                                # (2C,), permutation-invariant
    if pad_out:
        w_k = jnp.pad(w_k, ((0, 0), (0, co_out - co)))
        bias = jnp.pad(bias, (0, co_out - co))
    # TODO(synk): single-buffer the grid-invariant weight (pl.Buffered(1)) once
    # pipeline_mode is reliably supported on the main pallas_call path.
    w_k = w_k.astype(matmul_dtype)                     # (4C, co_out)
    b_k = bias.reshape(1, co_out).astype(jnp.float32)

    rows_total = B * hp
    in_bytes = jnp.dtype(x.dtype).itemsize
    mm_bytes = jnp.dtype(matmul_dtype).itemsize

    # ---- generation-aware tile / VMEM-limit sizing ----
    vmem_cap = _vmem_capacity_bytes()
    budget = int(vmem_cap * 0.6)                       # Mosaic scratch headroom
    per_tok = (2 * 4 * C * in_bytes                    # double-buffered input
               + 2 * co_out * in_bytes                 # double-buffered output
               + 6 * 4 * C * 4                         # f32 LN temporaries
               + 2 * co_out * 4)                       # f32 acc + store cast
    fixed = 2 * (4 * C * co_out * mm_bytes + co_out * 4) + (2 << 20)
    cap_tokens = max(64, (budget - fixed) // per_tok)
    tgt_tokens = max(wp, min(target_block_tokens, cap_tokens))

    th = max(1, min(rows_total, tgt_tokens // wp))     # merged rows per step
    grid = (pl.cdiv(rows_total, th),)
    blk_tokens = th * wp

    est_step = fixed + blk_tokens * per_tok
    vmem_limit = int(min(vmem_cap - (4 << 20),
                         max(32 << 20, int(est_step * 1.5))))

    tokens = rows_total * wp
    cost = pl.CostEstimate(
        flops=2 * tokens * (4 * C) * co_out,
        transcendentals=tokens,
        bytes_accessed=(tokens * 4 * C * in_bytes
                        + 4 * C * co_out * mm_bytes + co_out * 4
                        + tokens * co_out * in_bytes),
    )

    out = pl.pallas_call(
        _merge_ln_linear_kernel,
        out_shape=jax.ShapeDtypeStruct((tokens, co_out), x.dtype),
        grid=grid,
        in_specs=[
            # one contiguous block of th merged rows (both h-parities at once)
            pl.BlockSpec((th, 2, wp, 2 * C), lambda i: (i, 0, 0, 0)),
            # grid-invariant weight / bias: constant block index -> fetched once
            pl.BlockSpec((4 * C, co_out), lambda i: (0, 0)),
            pl.BlockSpec((1, co_out), lambda i: (0, 0)),
        ],
        out_specs=pl.BlockSpec((blk_tokens, co_out), lambda i: (i, 0)),
        compiler_params=pltpu.CompilerParams(
            dimension_semantics=("parallel",),
            vmem_limit_bytes=vmem_limit,
        ),
        cost_estimate=cost,
    )(xr, w_k, b_k)

    out = out.reshape(B, hp * wp, co_out)              # free metadata reshape
    if pad_out:
        out = out[:, :, :co]                           # only when 2C < 128
    return out


def _reference(x, H, W, gamma, beta, w_red):
    """Pure-JAX reference matching the PyTorch PatchMerging forward."""
    B, L, C = x.shape
    xv = x.reshape(B, H, W, C)
    if (H % 2) or (W % 2):
        xv = jnp.pad(xv, ((0, 0), (0, H % 2), (0, W % 2), (0, 0)))
    x0 = xv[:, 0::2, 0::2, :]
    x1 = xv[:, 1::2, 0::2, :]
    x2 = xv[:, 0::2, 1::2, :]
    x3 = xv[:, 1::2, 1::2, :]
    xc = jnp.concatenate([x0, x1, x2, x3], axis=-1).reshape(B, -1, 4 * C)
    mean = jnp.mean(xc, axis=-1, keepdims=True)
    var = jnp.mean((xc - mean) ** 2, axis=-1, keepdims=True)
    xn = (xc - mean) / jnp.sqrt(var + 1e-5) * gamma + beta
    return xn @ w_red


if __name__ == "__main__":
    key = jax.random.PRNGKey(0)
    k1, k2, k3, k4, k5 = jax.random.split(key, 5)

    def make_params(dim, kw, kg, kb):
        w_lin = jax.random.normal(kw, (2 * dim, 4 * dim), jnp.float32) * 0.02
        w_red = w_lin.T                                   # (4*dim, 2*dim)
        gamma = 1.0 + 0.1 * jax.random.normal(kg, (4 * dim,), jnp.float32)
        beta = 0.1 * jax.random.normal(kb, (4 * dim,), jnp.float32)
        return w_red, gamma, beta

    dim = 32
    w_red, gamma, beta = make_params(dim, k2, k3, k4)

    # case 1: even dims, f32 activations; bf16 (default) and f32 matmul paths
    B, H, W = 2, 16, 16
    x = jax.random.normal(k1, (B, H * W, dim), jnp.float32)
    ref = _reference(x, H, W, gamma, beta, w_red)
    out = jax.block_until_ready(patch_merging(x, H, W, gamma, beta, w_red))
    assert out.shape == (B, (H // 2) * (W // 2), 2 * dim), out.shape
    assert jnp.allclose(out, ref, atol=2e-2, rtol=2e-2), "case1 bf16-mm mismatch"
    out_f32 = jax.block_until_ready(
        patch_merging(x, H, W, gamma, beta, w_red, matmul_dtype=jnp.float32))
    assert jnp.allclose(out_f32, ref, atol=2e-2, rtol=2e-2), "case1 f32-mm mismatch"

    # case 2: multi-block grid with a partial (masked) tail block
    B2, H2, W2 = 1, 32, 32
    x2 = jax.random.normal(k2, (B2, H2 * W2, dim), jnp.float32)
    ref2 = _reference(x2, H2, W2, gamma, beta, w_red)
    out2 = jax.block_until_ready(
        patch_merging(x2, H2, W2, gamma, beta, w_red, target_block_tokens=96))
    assert jnp.allclose(out2, ref2, atol=2e-2, rtol=2e-2), "case2 tail mismatch"

    # case 3: odd spatial dims (bottom/right zero-padding path)
    B3, H3, W3 = 1, 15, 15
    x3 = jax.random.normal(k3, (B3, H3 * W3, dim), jnp.float32)
    ref3 = _reference(x3, H3, W3, gamma, beta, w_red)
    out3 = jax.block_until_ready(patch_merging(x3, H3, W3, gamma, beta, w_red))
    assert out3.shape == (B3, 8 * 8, 2 * dim), out3.shape
    assert jnp.allclose(out3, ref3, atol=2e-2, rtol=2e-2), "case3 odd-HW mismatch"

    # case 4: bfloat16 activations in / out (memory-bound win per review)
    x4 = x.astype(jnp.bfloat16)
    ref4 = _reference(x4.astype(jnp.float32), H, W, gamma, beta, w_red)
    out4 = jax.block_until_ready(patch_merging(x4, H, W, gamma, beta, w_red))
    assert out4.dtype == jnp.bfloat16
    assert jnp.allclose(out4.astype(jnp.float32), ref4, atol=3e-2, rtol=3e-2), \
        "case4 bf16-act mismatch"

    # case 5: wp not a multiple of 8 and 2C >= 128 (two-dot path, unpadded out)
    dim5 = 64
    w5, g5, b5 = make_params(dim5, k5, k4, k3)
    B5, H5, W5 = 1, 14, 14
    x5 = jax.random.normal(k5, (B5, H5 * W5, dim5), jnp.float32)
    ref5 = _reference(x5, H5, W5, g5, b5, w5)
    out5 = jax.block_until_ready(patch_merging(x5, H5, W5, g5, b5, w5))
    assert out5.shape == (B5, 7 * 7, 2 * dim5), out5.shape
    assert jnp.allclose(out5, ref5, atol=2e-2, rtol=2e-2), "case5 wp=7 mismatch"

    print("KERNEL_OK")
</pallas_src>

<mosaic_0001>
module attributes {stable_mosaic.version = 11 : i64} {
  func.func @_merge_ln_linear_kernel(%arg0: i32, %arg1: memref<16x2x8x64xf32, #tpu.memory_space<vmem>>, %arg2: memref<128x128xbf16, #tpu.memory_space<vmem>>, %arg3: memref<1x128xf32, #tpu.memory_space<vmem>>, %arg4: memref<128x128xf32, #tpu.memory_space<vmem>>) attributes {dimension_semantics = [#tpu.dimension_semantics<parallel>], iteration_bounds = array<i64: 1>, scalar_prefetch = 0 : i64, scratch_operands = 0 : i64, tpu.core_type = #tpu.core_type<tc>, window_params = [{transform_indices = @transform_0, window_bounds = array<i64: 16, 2, 8, 64>}, {pipeline_mode = #tpu.pipeline_mode<synchronous>, transform_indices = @transform_1, window_bounds = array<i64: 128, 128>}, {pipeline_mode = #tpu.pipeline_mode<synchronous>, transform_indices = @transform_2, window_bounds = array<i64: 1, 128>}, {transform_indices = @transform_3, window_bounds = array<i64: 128, 128>}]} {
    %c0 = arith.constant 0 : index
    %c0_0 = arith.constant 0 : index
    %c0_1 = arith.constant 0 : index
    %c0_2 = arith.constant 0 : index
    %0 = vector.load %arg1[%c0, %c0_0, %c0_1, %c0_2] : memref<16x2x8x64xf32, #tpu.memory_space<vmem>>, vector<16x2x8x64xf32>
    %1 = vector.extract_strided_slice %0 {offsets = [0, 0, 0, 0], sizes = [16, 1, 8, 64], strides = [1, 1, 1, 1]} : vector<16x2x8x64xf32> to vector<16x1x8x64xf32>
    %2 = vector.shape_cast %1 : vector<16x1x8x64xf32> to vector<16x8x64xf32>
    %3 = vector.shape_cast %2 : vector<16x8x64xf32> to vector<128x64xf32>
    %4 = vector.extract_strided_slice %0 {offsets = [0, 1, 0, 0], sizes = [16, 1, 8, 64], strides = [1, 1, 1, 1]} : vector<16x2x8x64xf32> to vector<16x1x8x64xf32>
    %5 = vector.shape_cast %4 : vector<16x1x8x64xf32> to vector<16x8x64xf32>
    %6 = vector.shape_cast %5 : vector<16x8x64xf32> to vector<128x64xf32>
    %cst = arith.constant dense<0.000000e+00> : vector<128xf32>
    %7 = vector.multi_reduction <add>, %3, %cst [1] : vector<128x64xf32> to vector<128xf32>
    %8 = vector.shape_cast %7 : vector<128xf32> to vector<128x1xf32>
    %cst_3 = arith.constant dense<0.000000e+00> : vector<128xf32>
    %9 = vector.multi_reduction <add>, %6, %cst_3 [1] : vector<128x64xf32> to vector<128xf32>
    %10 = vector.shape_cast %9 : vector<128xf32> to vector<128x1xf32>
    %11 = arith.addf %8, %10 : vector<128x1xf32>
    %cst_4 = arith.constant 7.812500e-03 : f32
    %12 = vector.broadcast %cst_4 : f32 to vector<128x1xf32>
    %13 = arith.mulf %11, %12 : vector<128x1xf32>
    %14 = vector.broadcast %13 : vector<128x1xf32> to vector<128x64xf32>
    %15 = arith.subf %3, %14 : vector<128x64xf32>
    %16 = vector.broadcast %13 : vector<128x1xf32> to vector<128x64xf32>
    %17 = arith.subf %6, %16 : vector<128x64xf32>
    %18 = arith.mulf %15, %15 : vector<128x64xf32>
    %cst_5 = arith.constant dense<0.000000e+00> : vector<128xf32>
    %19 = vector.multi_reduction <add>, %18, %cst_5 [1] : vector<128x64xf32> to vector<128xf32>
    %20 = vector.shape_cast %19 : vector<128xf32> to vector<128x1xf32>
    %21 = arith.mulf %17, %17 : vector<128x64xf32>
    %cst_6 = arith.constant dense<0.000000e+00> : vector<128xf32>
    %22 = vector.multi_reduction <add>, %21, %cst_6 [1] : vector<128x64xf32> to vector<128xf32>
    %23 = vector.shape_cast %22 : vector<128xf32> to vector<128x1xf32>
    %24 = arith.addf %20, %23 : vector<128x1xf32>
    %cst_7 = arith.constant 7.812500e-03 : f32
    %25 = vector.broadcast %cst_7 : f32 to vector<128x1xf32>
    %26 = arith.mulf %24, %25 : vector<128x1xf32>
    %cst_8 = arith.constant 9.99999974E-6 : f32
    %27 = vector.broadcast %cst_8 : f32 to vector<128x1xf32>
    %28 = arith.addf %26, %27 : vector<128x1xf32>
    %29 = math.rsqrt %28 : vector<128x1xf32>
    %c0_9 = arith.constant 0 : index
    %c0_10 = arith.constant 0 : index
    %30 = vector.load %arg2[%c0_9, %c0_10] : memref<128x128xbf16, #tpu.memory_space<vmem>>, vector<128x128xbf16>
    %31 = tpu.concatenate %15, %17 in 1 : vector<128x64xf32>, vector<128x64xf32> -> vector<128x128xf32>
    %32 = arith.truncf %31 : vector<128x128xf32> to vector<128x128xbf16>
    %cst_11 = arith.constant dense<0.000000e+00> : vector<128x128xf32>
    %33 = tpu.matmul %32, %30, %cst_11 {dimension_numbers = #tpu.dot_dimension_numbers<[1], [0], [0], [1], [0, 0, 1, 1], [], []>} : vector<128x128xbf16>, vector<128x128xbf16>, vector<128x128xf32> -> vector<128x128xf32>
    %34 = vector.broadcast %29 : vector<128x1xf32> to vector<128x128xf32>
    %35 = arith.mulf %33, %34 : vector<128x128xf32>
    %c0_12 = arith.constant 0 : index
    %c0_13 = arith.constant 0 : index
    %36 = vector.load %arg3[%c0_12, %c0_13] : memref<1x128xf32, #tpu.memory_space<vmem>>, vector<1x128xf32>
    %37 = vector.broadcast %36 : vector<1x128xf32> to vector<128x128xf32>
    %38 = arith.addf %35, %37 : vector<128x128xf32>
    %c0_14 = arith.constant 0 : index
    %c0_15 = arith.constant 0 : index
    %39 = vector.load %arg4[%c0_14, %c0_15] : memref<128x128xf32, #tpu.memory_space<vmem>>, vector<128x128xf32>
    tpu.vector_store %arg4[%c0_14, %c0_15], %38 {strides = array<i32>} : memref<128x128xf32, #tpu.memory_space<vmem>>, vector<128x128xf32>,
    return
  }
  func.func @transform_0(%arg0: i32) -> (i32, i32, i32, i32) {
    %c0_i32 = arith.constant 0 : i32
    %c0_i32_0 = arith.constant 0 : i32
    %c0_i32_1 = arith.constant 0 : i32
    %c0_i32_2 = arith.constant 0 : i32
    return %arg0, %c0_i32, %c0_i32_0, %c0_i32_1 : i32, i32, i32, i32
  }
  func.func @transform_1(%arg0: i32) -> (i32, i32) {
    %c0_i32 = arith.constant 0 : i32
    %c0_i32_0 = arith.constant 0 : i32
    %c0_i32_1 = arith.constant 0 : i32
    return %c0_i32, %c0_i32_0 : i32, i32
  }
  func.func @transform_2(%arg0: i32) -> (i32, i32) {
    %c0_i32 = arith.constant 0 : i32
    %c0_i32_0 = arith.constant 0 : i32
    %c0_i32_1 = arith.constant 0 : i32
    return %c0_i32, %c0_i32_0 : i32, i32
  }
  func.func @transform_3(%arg0: i32) -> (i32, i32) {
    %c0_i32 = arith.constant 0 : i32
    %c0_i32_0 = arith.constant 0 : i32
    return %arg0, %c0_i32 : i32, i32
  }
}

</mosaic_0001>

<bundles_post_ra>
// kernel: tpu_custom_call.1
= control target key start
LH: loop header
LB: loop body
LE: loop exit
PB: predicated region body
PF: predicated region fallthrough
CT: control target
= control target key end

     0   :  { %8 = vsyncpa [#allocation3], 0  ;;  %s1527_s0 = inlined_call_operand.hbm [shape: f32[16,2,8,64], index: 0, kind: input, shape index: {}]   ;;  %s1528_s1 = inlined_call_operand.hbm [shape: bf16[128,128], index: 1, kind: input, shape index: {}]   ;;  %s1529_s2 = inlined_call_operand.vmem [shape: f32[1,128], index: 2, kind: input, shape index: {}]   ;;  %s1530_s3 = inlined_call_operand.hbm [shape: f32[128,128], index: 3, kind: output, shape index: {}]  }
   0x1   :  { %9 = vsyncpa [#allocation6], 0 }
   0x2   :  { %10 = vsyncpa [#allocation4], 0  ;;  %s983_s12 = smov [#allocation2]   ;;  %s911_s16 = scalar_lea.hbm %s1527_s0, 4096 }
   0x3   :  { %s16_s13 = sshll.u32 %s983_s12, 4  ;;  %p912_p0 = scmp.ne.s32.totalorder %s1527_s0, %s911_s16  ;;  %s17_s13 = int_to_ptr.vmem [resolvable:$true] %s16_s13 }
   0x4   :  { %p915_p1 = scmp.lt.u32.totalorder %s911_s16, %s1527_s0 }
   0x6   :  { %p917_p2 = pnand %p915_p1, %p912_p0 }
   0x8   :  { %920 = shalt.err (!%p917_p2)
}
   0x9   :  { %s921_s21 = scalar_lea.vmem %s17_s13, 4096  ;;  %p926_p4 = scmp.lt.s32.totalorder %s17_s13, %s17_s13 }
   0xa   :  { %p922_p3 = scmp.ne.s32.totalorder %s17_s13, %s921_s21  ;;  %p927_p5 = scmp.lt.s32.totalorder %s921_s21, %s921_s21 }
   0xc   :  { %p928_p6 = por %p927_p5, %p926_p4 }
   0xe   :  { %p929_p7 = pnand %p928_p6, %p922_p3 }
  0x10   :  { %932 = shalt.err (!%p929_p7)
}
  0x11   :  { %s984_s22 = smov 128   ;;  %s985_s23 = smov 8  }
  0x12   :  { %22 = dma.hbm_to_vmem [thread:$0]  %s1527_s0, 4096, %s17_s13, [#allocation3], %s984_s22, %s984_s22, %s985_s23  }
  0x13   :  { %s986_s26 = smov [#allocation5]   ;;  %s933_s30 = scalar_lea.hbm %s1528_s1, 1024 }
  0x14   :  { %s28_s27 = sshll.u32 %s986_s26, 4  ;;  %p934_p8 = scmp.ne.s32.totalorder %s1528_s1, %s933_s30  ;;  %s29_s27 = int_to_ptr.vmem [resolvable:$true] %s28_s27 }
  0x15   :  { %p937_p9 = scmp.lt.u32.totalorder %s933_s30, %s1528_s1 }
  0x17   :  { %p939_p10 = pnand %p937_p9, %p934_p8 }
  0x19   :  { %942 = shalt.err (!%p939_p10)
}
  0x1a   :  { %s943_s8 = scalar_lea.vmem %s29_s27, 1024  ;;  %p948_p12 = scmp.lt.s32.totalorder %s29_s27, %s29_s27 }
  0x1b   :  { %p944_p11 = scmp.ne.s32.totalorder %s29_s27, %s943_s8  ;;  %p949_p13 = scmp.lt.s32.totalorder %s943_s8, %s943_s8 }
  0x1d   :  { %p950_p0 = por %p949_p13, %p948_p12 }
  0x1f   :  { %p951_p1 = pnand %p950_p0, %p944_p11 }
  0x21   :  { %954 = shalt.err (!%p951_p1)
}
  0x22   :  { %s987_s0 = smov 64   ;;  %s988_s9 = smov 4  }
  0x23   :  { %34 = dma.hbm_to_vmem [thread:$0]  %s1528_s1, 1024, %s29_s27, [#allocation6], %s987_s0, %s987_s0, %s988_s9  }
  0x24   :  { %977 = dma.done.wait [#allocation3], 4096  }
  0x25   :  { %978 = vsyncadd [#allocation3], 4294963200 }
  0x26   :  { %979 = dma.done.wait [#allocation6], 1024  }
  0x27   :  { %980 = vsyncadd [#allocation6], 4294966272  ;;  %vm76_vm0 = vcmask 523264   ;;  %v1039_v0 = vld [vmem:[#allocation2 + $0x80] sm:$0xff]  ;;  %v1043_v2 = vld [vmem:[#allocation2 + $0x90] sm:$0xff] }
  0x28   :  { %v1041_v1 = vld [vmem:[#allocation2] sm:$0xff]  ;;  %v101_v3 = vsel %vm76_vm0, %v1039_v0, 0.0  ;;  %v1049_v5 = vld [vmem:[#allocation2 + $0x10] sm:$0xff]  ;;  %v104_v6 = vsel %vm76_vm0, %v1043_v2, 0.0  ;;  %v1055_v8 = vld [vmem:[#allocation2 + $0x18] sm:$0xff] }
  0x29   :  { %v77_v4 = vsel %vm76_vm0, %v1041_v1, 0.0  ;;  %102 = vadd.xlane.f32.xlu1 %v101_v3  ;;  %v80_v7 = vsel %vm76_vm0, %v1049_v5, 0.0  ;;  %v1057_v9 = vld [vmem:[#allocation2 + $0x8] sm:$0xff]  ;;  %v128_v10 = vsel %vm76_vm0, %v1055_v8, 0.0  ;;  %v1063_v12 = vld [vmem:[#allocation2 + $0x98] sm:$0xff]  ;;  %v1067_v14 = vld [vmem:[#allocation2 + $0x30] sm:$0xff] }
  0x2a   :  { %78 = vadd.xlane.f32.xlu0 %v77_v4  ;;  %v125_v11 = vsel %vm76_vm0, %v1057_v9, 0.0  ;;  %v1065_v13 = vld [vmem:[#allocation2 + $0x88] sm:$0xff]  ;;  %v1069_v15 = vld [vmem:[#allocation2 + $0x20] sm:$0xff]  ;;  %v152_v16 = vsel %vm76_vm0, %v1063_v12, 0.0  ;;  %v86_v18 = vsel %vm76_vm0, %v1067_v14, 0.0  ;;  %v1079_v20 = vld [vmem:[#allocation2 + $0xb0] sm:$0xff] }
  0x2b   :  { %v149_v17 = vsel %vm76_vm0, %v1065_v13, 0.0  ;;  %v83_v19 = vsel %vm76_vm0, %v1069_v15, 0.0  ;;  %v1081_v21 = vld [vmem:[#allocation2 + $0xa0] sm:$0xff]  ;;  %v110_v22 = vsel %vm76_vm0, %v1079_v20, 0.0  ;;  %v1087_v24 = vld [vmem:[#allocation2 + $0x38] sm:$0xff]  ;;  %v1089_v25 = vld [vmem:[#allocation2 + $0x28] sm:$0xff] }
  0x2c   :  { %v107_v23 = vsel %vm76_vm0, %v1081_v21, 0.0  ;;  %v134_v26 = vsel %vm76_vm0, %v1087_v24, 0.0  ;;  %v131_v27 = vsel %vm76_vm0, %v1089_v25, 0.0  ;;  %v1095_v28 = vld [vmem:[#allocation2 + $0xb8] sm:$0xff]  ;;  %v1097_v29 = vld [vmem:[#allocation2 + $0xa8] sm:$0xff]  ;;  %v1103_v32 = vld [vmem:[#allocation2 + $0x50] sm:$0xff] }
  0x2d   :  { %105 = vadd.xlane.f32.xlu1 %v104_v6  ;;  %v158_v30 = vsel %vm76_vm0, %v1095_v28, 0.0  ;;  %v155_v31 = vsel %vm76_vm0, %v1097_v29, 0.0  ;;  %v1105_v33 = vld [vmem:[#allocation2 + $0x40] sm:$0xff]  ;;  %v92_v34 = vsel %vm76_vm0, %v1103_v32, 0.0  ;;  %v1111_v36 = vld [vmem:[#allocation2 + $0xd0] sm:$0xff]  ;;  %v1119_v40 = vld [vmem:[#allocation2 + $0x58] sm:$0xff] }
  0x2e   :  { %81 = vadd.xlane.f32.xlu0 %v80_v7  ;;  %v89_v35 = vsel %vm76_vm0, %v1105_v33, 0.0  ;;  %v1113_v37 = vld [vmem:[#allocation2 + $0xc0] sm:$0xff]  ;;  %v116_v38 = vsel %vm76_vm0, %v1111_v36, 0.0  ;;  %v1121_v41 = vld [vmem:[#allocation2 + $0x48] sm:$0xff]  ;;  %v140_v42 = vsel %vm76_vm0, %v1119_v40, 0.0  ;;  %v1127_v44 = vld [vmem:[#allocation2 + $0xd8] sm:$0xff] }
  0x2f   :  { %v113_v39 = vsel %vm76_vm0, %v1113_v37, 0.0  ;;  %v137_v43 = vsel %vm76_vm0, %v1121_v41, 0.0  ;;  %v1129_v45 = vld [vmem:[#allocation2 + $0xc8] sm:$0xff]  ;;  %v164_v46 = vsel %vm76_vm0, %v1127_v44, 0.0  ;;  %v1135_v48 = vld [vmem:[#allocation2 + $0x70] sm:$0xff]  ;;  %v1137_v49 = vld [vmem:[#allocation2 + $0x60] sm:$0xff] }
  0x30   :  { %v161_v47 = vsel %vm76_vm0, %v1129_v45, 0.0  ;;  %v98_v50 = vsel %vm76_vm0, %v1135_v48, 0.0  ;;  %v95_v51 = vsel %vm76_vm0, %v1137_v49, 0.0  ;;  %v1143_v52 = vld [vmem:[#allocation2 + $0xf0] sm:$0xff]  ;;  %v1145_v53 = vld [vmem:[#allocation2 + $0xe0] sm:$0xff]  ;;  %v1151_v56 = vld [vmem:[#allocation2 + $0x78] sm:$0xff] }
  0x31   :  { %129 = vadd.xlane.f32.xlu1 %v128_v10  ;;  %v122_v54 = vsel %vm76_vm0, %v1143_v52, 0.0  ;;  %v119_v55 = vsel %vm76_vm0, %v1145_v53, 0.0  ;;  %v1153_v57 = vld [vmem:[#allocation2 + $0x68] sm:$0xff]  ;;  %v146_v58 = vsel %vm76_vm0, %v1151_v56, 0.0  ;;  %v1159_v60 = vld [vmem:[#allocation2 + $0xf8] sm:$0xff]  ;;  %v871_v3 = vld [vmem:[#allocation5] sm:$0xff]  }
  0x32   :  { %126 = vadd.xlane.f32.xlu0 %v125_v11  ;;  %v143_v59 = vsel %vm76_vm0, %v1153_v57, 0.0  ;;  %v1161_v61 = vld [vmem:[#allocation2 + $0xe8] sm:$0xff]  ;;  %v170_v62 = vsel %vm76_vm0, %v1159_v60, 0.0  ;;  %776 = vmatprep.subr.bf16.mxu0 %v871_v3  ;;  %v873_v10 = vld [vmem:[#allocation5 + $0x10] sm:$0xff]  }
  0x33   :  { %v167_v63 = vsel %vm76_vm0, %v1161_v61, 0.0  ;;  %808 = vmatprep.subr.bf16.mxu1 %v871_v3  ;;  %777 = vmatpush3.bf16.msra.mxu0 %v871_v3  ;;  %v872_v4 = vld [vmem:[#allocation5 + $0x8] sm:$0xff]  }
  0x34   :  { %816 = vmatpush3.bf16.msra.mxu1 %v871_v3  ;;  %778 = vmatprep.subr.bf16.mxu0 %v872_v4 }
  0x35   :  { %153 = vadd.xlane.f32.xlu1 %v152_v16  ;;  %809 = vmatprep.subr.bf16.mxu1 %v872_v4 }
  0x36   :  { %150 = vadd.xlane.f32.xlu0 %v149_v17  ;;  %v874_v17 = vld [vmem:[#allocation5 + $0x18] sm:$0xff]  }
  0x37   :  { %779 = vmatpush3.bf16.msra.mxu0 %v872_v4 }
  0x38   :  { %817 = vmatpush3.bf16.msra.mxu1 %v872_v4  ;;  %780 = vmatprep.subr.bf16.mxu0 %v873_v10 }
  0x39   :  { %87 = vadd.xlane.f32.xlu1 %v86_v18  ;;  %810 = vmatprep.subr.bf16.mxu1 %v873_v10 }
  0x3a   :  { %84 = vadd.xlane.f32.xlu0 %v83_v19 }
  0x3b   :  { %781 = vmatpush3.bf16.msra.mxu0 %v873_v10 }
  0x3c   :  { %818 = vmatpush3.bf16.msra.mxu1 %v873_v10  ;;  %782 = vmatprep.subr.bf16.mxu0 %v874_v17 }
  0x3d   :  { %111 = vadd.xlane.f32.xlu1 %v110_v22  ;;  %811 = vmatprep.subr.bf16.mxu1 %v874_v17 }
  0x3e   :  { %108 = vadd.xlane.f32.xlu0 %v107_v23 }
  0x3f   :  { %783 = vmatpush3.bf16.msra.mxu0 %v874_v17 }
  0x40   :  { %819 = vmatpush3.bf16.msra.mxu1 %v874_v17 }
  0x41   :  { %135 = vadd.xlane.f32.xlu1 %v134_v26  ;;  %v875_v26 = vld [vmem:[#allocation5 + $0x20] sm:$0xff]  }
  0x42   :  { %132 = vadd.xlane.f32.xlu0 %v131_v27  ;;  %784 = vmatprep.subr.bf16.mxu0 %v875_v26 }
  0x43   :  { %812 = vmatprep.subr.bf16.mxu1 %v875_v26  ;;  %785 = vmatpush3.bf16.msra.mxu0 %v875_v26 }
  0x44   :  { %820 = vmatpush3.bf16.msra.mxu1 %v875_v26 }
  0x45   :  { %159 = vadd.xlane.f32.xlu1 %v158_v30 }
  0x46   :  { %156 = vadd.xlane.f32.xlu0 %v155_v31 }
  0x49   :  { %93 = vadd.xlane.f32.xlu1 %v92_v34 }
  0x4a   :  { %90 = vadd.xlane.f32.xlu0 %v89_v35  ;;  %v876_v35 = vld [vmem:[#allocation5 + $0x28] sm:$0xff]  }
  0x4b   :  { %786 = vmatprep.subr.bf16.mxu0 %v876_v35  ;;  %813 = vmatprep.subr.bf16.mxu1 %v876_v35 }
  0x4c   :  { %787 = vmatpush3.bf16.msra.mxu0 %v876_v35  ;;  %821 = vmatpush3.bf16.msra.mxu1 %v876_v35 }
  0x4d   :  { %117 = vadd.xlane.f32.xlu1 %v116_v38 }
  0x4e   :  { %114 = vadd.xlane.f32.xlu0 %v113_v39 }
  0x51   :  { %141 = vadd.xlane.f32.xlu1 %v140_v42 }
  0x52   :  { %138 = vadd.xlane.f32.xlu0 %v137_v43 }
  0x55   :  { %165 = vadd.xlane.f32.xlu1 %v164_v46 }
  0x56   :  { %162 = vadd.xlane.f32.xlu0 %v161_v47 }
  0x59   :  { %99 = vadd.xlane.f32.xlu1 %v98_v50 }
  0x5a   :  { %96 = vadd.xlane.f32.xlu0 %v95_v51 }
  0x5d   :  { %123 = vadd.xlane.f32.xlu1 %v122_v54 }
  0x5e   :  { %120 = vadd.xlane.f32.xlu0 %v119_v55 }
  0x61   :  { %147 = vadd.xlane.f32.xlu1 %v146_v58 }
  0x62   :  { %144 = vadd.xlane.f32.xlu0 %v143_v59 }
  0x65   :  { %171 = vadd.xlane.f32.xlu1 %v170_v62 }
  0x66   :  { %168 = vadd.xlane.f32.xlu0 %v167_v63  ;;  %v878_v63 = vld [vmem:[#allocation5 + $0x38] sm:$0xff]  }
  0xb6   :  { %v103_v6 = vpop.xlane.xlu1 %102 }
  0xb7   :  { %v79_v7 = vpop.xlane.xlu0 %78 }
  0xba   :  { %v106_v11 = vpop.xlane.xlu1 %105 }
  0xbb   :  { %v82_v16 = vpop.xlane.xlu0 %81 }
  0xbe   :  { %v130_v18 = vpop.xlane.xlu1 %129 }
  0xbf   :  { %v127_v19 = vpop.xlane.xlu0 %126  ;;  %v174_v22 = vadd.f32 %v130_v18, %v82_v16 }
  0xc0   :  { %v173_v23 = vadd.f32 %v127_v19, %v79_v7 }
  0xc1   :  { %v1167_v27 = vmul.f32 0.0078125, %v174_v22 }
  0xc2   :  { %v1169_v30 = vmul.f32 0.0078125, %v173_v23  ;;  %v154_v31 = vpop.xlane.xlu1 %153 }
  0xc3   :  { %v151_v34 = vpop.xlane.xlu0 %150  ;;  %v1173_v38 = vsub.f32 %v1055_v8, %v1167_v27  ;;  %v182_v42 = vadd.f32 %v154_v31, %v106_v11  ;;  %v877_v8 = vld [vmem:[#allocation5 + $0x30] sm:$0xff]  }
  0xc4   :  { %v1177_v39 = vsub.f32 %v1057_v9, %v1169_v30  ;;  %v181_v43 = vadd.f32 %v151_v34, %v103_v6  ;;  %788 = vmatprep.subr.bf16.mxu0 %v877_v8  ;;  %814 = vmatprep.subr.bf16.mxu1 %v877_v8 }
  0xc5   :  { %v1181_v47 = vmul.f32 0.0078125, %v182_v42  ;;  %789 = vmatpush3.bf16.msra.mxu0 %v877_v8  ;;  %822 = vmatpush3.bf16.msra.mxu1 %v877_v8 }
  0xc6   :  { %v831_v46 = vpack.i.bf16 %v1173_v38, %v1177_v39  ;;  %v1183_v50 = vmul.f32 0.0078125, %v181_v43  ;;  %v88_v51 = vpop.xlane.xlu1 %87  ;;  %790 = vmatprep.subr.bf16.mxu0 %v878_v63  ;;  %815 = vmatprep.subr.bf16.mxu1 %v878_v63 }
  0xc7   :  { %v85_v54 = vpop.xlane.xlu0 %84  ;;  %v1188_v9 = vsub.f32 %v1063_v12, %v1181_v47 }
  0xc8   :  { %832 = vrot.lane.b32.xlu0 %v831_v46, %s987_s0  ;;  %v1192_v55 = vsub.f32 %v1065_v13, %v1183_v50 }
  0xc9   :  { %791 = vmatpush3.bf16.msra.mxu0 %v878_v63  ;;  %823 = vmatpush3.bf16.msra.mxu1 %v878_v63 }
  0xca   :  { %v112_v58 = vpop.xlane.xlu1 %111  ;;  %v836_v62 = vpack.i.bf16 %v1188_v9, %v1192_v55 }
  0xcb   :  { %v109_v59 = vpop.xlane.xlu0 %108 }
  0xcc   :  { %837 = vrot.lane.b32.xlu1 %v836_v62, %s987_s0 }
  0xce   :  { %v136_v12 = vpop.xlane.xlu1 %135 }
  0xcf   :  { %v133_v3 = vpop.xlane.xlu0 %132  ;;  %v176_v4 = vadd.f32 %v136_v12, %v88_v51 }
  0xd0   :  { %v175_v13 = vadd.f32 %v133_v3, %v85_v54 }
  0xd1   :  { %v1197_v6 = vmul.f32 0.0078125, %v176_v4 }
  0xd2   :  { %v1199_v7 = vmul.f32 0.0078125, %v175_v13  ;;  %v160_v10 = vpop.xlane.xlu1 %159 }
  0xd3   :  { %v157_v11 = vpop.xlane.xlu0 %156  ;;  %v1203_v16 = vsub.f32 %v1087_v24, %v1197_v6  ;;  %v184_v18 = vadd.f32 %v160_v10, %v112_v58 }
  0xd4   :  { %v1207_v17 = vsub.f32 %v1089_v25, %v1199_v7  ;;  %v183_v19 = vadd.f32 %v157_v11, %v109_v59 }
  0xd5   :  { %v1211_v23 = vmul.f32 0.0078125, %v184_v18 }
  0xd6   :  { %v841_v22 = vpack.i.bf16 %v1203_v16, %v1207_v17  ;;  %v1213_v26 = vmul.f32 0.0078125, %v183_v19  ;;  %v94_v31 = vpop.xlane.xlu1 %93 }
  0xd7   :  { %v91_v34 = vpop.xlane.xlu0 %90  ;;  %v1218_v24 = vsub.f32 %v1095_v28, %v1211_v23 }
  0xd8   :  { %842 = vrot.lane.b32.xlu1 %v841_v22, %s987_s0  ;;  %v1222_v25 = vsub.f32 %v1097_v29, %v1213_v26 }
  0xda   :  { %v118_v35 = vpop.xlane.xlu1 %117  ;;  %v846_v43 = vpack.i.bf16 %v1218_v24, %v1222_v25 }
  0xdb   :  { %v115_v42 = vpop.xlane.xlu0 %114 }
  0xdc   :  { %847 = vrot.lane.b32.xlu1 %v846_v43, %s987_s0 }
  0xde   :  { %v142_v46 = vpop.xlane.xlu1 %141 }
  0xdf   :  { %v139_v51 = vpop.xlane.xlu0 %138  ;;  %v178_v54 = vadd.f32 %v142_v46, %v94_v31 }
  0xe0   :  { %v177_v8 = vadd.f32 %v139_v51, %v91_v34 }
  0xe1   :  { %v194_v58 = vmul.f32 0.0078125, %v178_v54 }
  0xe2   :  { %v193_v59 = vmul.f32 0.0078125, %v177_v8  ;;  %v166_v62 = vpop.xlane.xlu1 %165 }
  0xe3   :  { %v163_v28 = vpop.xlane.xlu0 %162  ;;  %v1228_v63 = vsub.f32 %v1119_v40, %v194_v58  ;;  %v186_v12 = vadd.f32 %v166_v62, %v118_v35 }
  0xe4   :  { %v1231_v29 = vsub.f32 %v1121_v41, %v193_v59  ;;  %v185_v3 = vadd.f32 %v163_v28, %v115_v42 }
  0xe5   :  { %v1235_v13 = vmul.f32 0.0078125, %v186_v12 }
  0xe6   :  { %v851_v4 = vpack.i.bf16 %v1228_v63, %v1231_v29  ;;  %v1237_v10 = vmul.f32 0.0078125, %v185_v3  ;;  %v100_v11 = vpop.xlane.xlu1 %99 }
  0xe7   :  { %v97_v18 = vpop.xlane.xlu0 %96  ;;  %v1242_v40 = vsub.f32 %v1127_v44, %v1235_v13 }
  0xe8   :  { %852 = vrot.lane.b32.xlu0 %v851_v4, %s987_s0  ;;  %v1246_v41 = vsub.f32 %v1129_v45, %v1237_v10 }
  0xea   :  { %v124_v19 = vpop.xlane.xlu1 %123  ;;  %v856_v31 = vpack.i.bf16 %v1242_v40, %v1246_v41 }
  0xeb   :  { %v121_v22 = vpop.xlane.xlu0 %120 }
  0xec   :  { %857 = vrot.lane.b32.xlu1 %v856_v31, %s987_s0 }
  0xee   :  { %v148_v34 = vpop.xlane.xlu1 %147 }
  0xef   :  { %v145_v35 = vpop.xlane.xlu0 %144  ;;  %v180_v42 = vadd.f32 %v148_v34, %v100_v11 }
  0xf0   :  { %v179_v43 = vadd.f32 %v145_v35, %v97_v18 }
  0xf1   :  { %v196_v46 = vmul.f32 0.0078125, %v180_v42 }
  0xf2   :  { %v195_v51 = vmul.f32 0.0078125, %v179_v43  ;;  %v172_v54 = vpop.xlane.xlu1 %171 }
  0xf3   :  { %v169_v44 = vpop.xlane.xlu0 %168  ;;  %v1252_v8 = vsub.f32 %v1151_v56, %v196_v46  ;;  %v188_v62 = vadd.f32 %v172_v54, %v124_v19  ;;  %v1275_v19 = vsub.f32 %v1069_v15, %v1199_v7  ;;  %v1291_v15 = vsub.f32 %v1105_v33, %v193_v59 }
  0xf4   :  { %v1255_v45 = vsub.f32 %v1153_v57, %v195_v51  ;;  %v187_v28 = vadd.f32 %v169_v44, %v121_v22  ;;  %v1271_v57 = vsub.f32 %v1041_v1, %v1169_v30  ;;  %v1288_v1 = vsub.f32 %v1049_v5, %v1167_v27 }
  0xf5   :  { %v204_v3 = vmul.f32 0.0078125, %v188_v62  ;;  %v239_v31 = vmul.f32 %v1275_v19, %v1275_v19  ;;  %v1302_v34 = vsub.f32 %v1137_v49, %v195_v51  ;;  %v241_v33 = vmul.f32 %v1291_v15, %v1291_v15 }
  0xf6   :  { %v861_v12 = vpack.i.bf16 %v1252_v8, %v1255_v45  ;;  %v203_v4 = vmul.f32 0.0078125, %v187_v28  ;;  %v1308_v27 = vsub.f32 %v1135_v48, %v196_v46  ;;  %v1322_v48 = vsub.f32 %v1043_v2, %v1181_v47 }
  0xf7   :  { %v1261_v11 = vsub.f32 %v1159_v60, %v204_v3  ;;  %v237_v60 = vmul.f32 %v1271_v57, %v1271_v57  ;;  %v259_v30 = vsel %vm76_vm0, %v239_v31, 0.0  ;;  %v265_v49 = vsel %vm76_vm0, %v241_v33, 0.0 }
  0xf8   :  { %862 = vrot.lane.b32.xlu0 %v861_v12, %s987_s0  ;;  %v1264_v18 = vsub.f32 %v1161_v61, %v203_v4  ;;  %v1281_v61 = vsub.f32 %v1067_v14, %v1197_v6  ;;  %v1297_v14 = vsub.f32 %v1103_v32, %v194_v58  ;;  %v238_v6 = vmul.f32 %v1288_v1, %v1288_v1 }
  0xf9   :  { %v253_v22 = vsel %vm76_vm0, %v237_v60, 0.0  ;;  %v1315_v58 = vsub.f32 %v1039_v0, %v1183_v50  ;;  %v243_v35 = vmul.f32 %v1302_v34, %v1302_v34  ;;  %v244_v43 = vmul.f32 %v1308_v27, %v1308_v27 }
  0xfa   :  { %v866_v56 = vpack.i.bf16 %v1261_v11, %v1264_v18  ;;  %v240_v7 = vmul.f32 %v1281_v61, %v1281_v61  ;;  %v256_v59 = vsel %vm76_vm0, %v238_v6, 0.0  ;;  %v242_v32 = vmul.f32 %v1297_v14, %v1297_v14 }
  0xfb   :  { %v1329_v0 = vsub.f32 %v1081_v21, %v1213_v26  ;;  %v271_v50 = vsel %vm76_vm0, %v243_v35, 0.0  ;;  %v245_v46 = vmul.f32 %v1315_v58, %v1315_v58  ;;  %v1336_v2 = vsub.f32 %v1079_v20, %v1211_v23 }
  0xfc   :  { %867 = vrot.lane.b32.xlu1 %v866_v56, %s987_s0  ;;  %v262_v5 = vsel %vm76_vm0, %v240_v7, 0.0  ;;  %v268_v42 = vsel %vm76_vm0, %v242_v32, 0.0  ;;  %v274_v47 = vsel %vm76_vm0, %v244_v43, 0.0  ;;  %v246_v51 = vmul.f32 %v1322_v48, %v1322_v48 }
  0xfd   :  { %v1343_v21 = vsub.f32 %v1113_v37, %v1237_v10  ;;  %v277_v26 = vsel %vm76_vm0, %v245_v46, 0.0  ;;  %v247_v54 = vmul.f32 %v1329_v0, %v1329_v0  ;;  %v1350_v20 = vsub.f32 %v1111_v36, %v1235_v13 }
  0xfe   :  { %v280_v23 = vsel %vm76_vm0, %v246_v51, 0.0  ;;  %v248_v44 = vmul.f32 %v1336_v2, %v1336_v2  ;;  %v1356_v62 = vsub.f32 %v1145_v53, %v203_v4  ;;  %v1362_v28 = vsub.f32 %v1143_v52, %v204_v3 }
  0xff   :  { %v283_v37 = vsel %vm76_vm0, %v247_v54, 0.0  ;;  %v249_v10 = vmul.f32 %v1343_v21, %v1343_v21  ;;  %v250_v13 = vmul.f32 %v1350_v20, %v1350_v20  ;;  %v301_v3 = vmul.f32 %v1177_v39, %v1177_v39 }
 0x100   :  { %v286_v36 = vsel %vm76_vm0, %v248_v44, 0.0  ;;  %v251_v53 = vmul.f32 %v1356_v62, %v1356_v62  ;;  %v252_v56 = vmul.f32 %v1362_v28, %v1362_v28  ;;  %v303_v7 = vmul.f32 %v1207_v17, %v1207_v17 }
 0x101   :  { %v289_v12 = vsel %vm76_vm0, %v249_v10, 0.0  ;;  %v292_v4 = vsel %vm76_vm0, %v250_v13, 0.0  ;;  %v304_v39 = vmul.f32 %v1203_v16, %v1203_v16  ;;  %v305_v17 = vmul.f32 %v1231_v29, %v1231_v29 }
 0x102   :  { %v295_v52 = vsel %vm76_vm0, %v251_v53, 0.0  ;;  %v298_v60 = vsel %vm76_vm0, %v252_v56, 0.0  ;;  %v323_v32 = vsel %vm76_vm0, %v303_v7, 0.0  ;;  %v306_v16 = vmul.f32 %v1228_v63, %v1228_v63 }
 0x103   :  { %v307_v29 = vmul.f32 %v1255_v45, %v1255_v45  ;;  %v310_v45 = vmul.f32 %v1188_v9, %v1188_v9 }
 0x104   :  { %v332_v51 = vsel %vm76_vm0, %v306_v16, 0.0 }
 0x105   :  { %v335_v63 = vsel %vm76_vm0, %v307_v29, 0.0  ;;  %v344_v10 = vsel %vm76_vm0, %v310_v45, 0.0 }
 0x117   :  { %254 = vadd.xlane.f32.xlu0 %v253_v22  ;;  %v302_v22 = vmul.f32 %v1173_v38, %v1173_v38 }
 0x119   :  { %v320_v33 = vsel %vm76_vm0, %v302_v22, 0.0 }
 0x11b   :  { %260 = vadd.xlane.f32.xlu0 %v259_v30  ;;  %v317_v30 = vsel %vm76_vm0, %v301_v3, 0.0 }
 0x11f   :  { %263 = vadd.xlane.f32.xlu0 %v262_v5 }
 0x120   :  { %257 = vadd.xlane.f32.xlu1 %v256_v59 }
 0x123   :  { %266 = vadd.xlane.f32.xlu0 %v265_v49 }
 0x124   :  { %269 = vadd.xlane.f32.xlu1 %v268_v42 }
 0x127   :  { %272 = vadd.xlane.f32.xlu0 %v271_v50  ;;  %v326_v50 = vsel %vm76_vm0, %v304_v39, 0.0 }
 0x128   :  { %275 = vadd.xlane.f32.xlu1 %v274_v47 }
 0x12b   :  { %278 = vadd.xlane.f32.xlu0 %v277_v26  ;;  %v308_v26 = vmul.f32 %v1252_v8, %v1252_v8  ;;  %v311_v8 = vmul.f32 %v1222_v25, %v1222_v25  ;;  %v313_v25 = vmul.f32 %v1246_v41, %v1246_v41  ;;  %v315_v41 = vmul.f32 %v1264_v18, %v1264_v18 }
 0x12c   :  { %281 = vadd.xlane.f32.xlu1 %v280_v23 }
 0x12d   :  { %v347_v13 = vsel %vm76_vm0, %v311_v8, 0.0 }
 0x12f   :  { %284 = vadd.xlane.f32.xlu0 %v283_v37 }
 0x130   :  { %287 = vadd.xlane.f32.xlu1 %v286_v36 }
 0x133   :  { %290 = vadd.xlane.f32.xlu0 %v289_v12 }
 0x134   :  { %293 = vadd.xlane.f32.xlu1 %v292_v4 }
 0x137   :  { %296 = vadd.xlane.f32.xlu0 %v295_v52 }
 0x138   :  { %299 = vadd.xlane.f32.xlu1 %v298_v60 }
 0x13a   :  { %v833_v31 = vpop.permute.xlu0 %832 }
 0x13b   :  { %v835_v6 = vunpack.i.h.bf16 %v833_v31  ;;  %v834_v5 = vunpack.i.l.bf16 %v833_v31  ;;  %318 = vadd.xlane.f32.xlu0 %v317_v30  ;;  %v316_v31 = vmul.f32 %v1261_v11, %v1261_v11 }
 0x13c   :  { %321 = vadd.xlane.f32.xlu1 %v320_v33 }
 0x13d   :  { %v509_v59 = vsel %vm76_vm0, %v1271_v57, %v834_v5  ;;  %v510_v38 = vsel %vm76_vm0, %v1288_v1, %v835_v6  ;;  %v329_v57 = vsel %vm76_vm0, %v305_v17, 0.0 }
 0x13e   :  { %v525_v49 = vpack.c.bf16 %v510_v38, %v509_v59  ;;  %v838_v35 = vpop.permute.xlu1 %837 }
 0x13f   :  { %324 = vadd.xlane.f32.xlu0 %v323_v32  ;;  %v840_v42 = vunpack.i.h.bf16 %v838_v35  ;;  %v839_v43 = vunpack.i.l.bf16 %v838_v35 }
 0x140   :  { %792 = vmatprep.mubr.bf16.mxu0 %v525_v49  ;;  %327 = vadd.xlane.f32.xlu1 %v326_v50 }
 0x141   :  { %v517_v1 = vsel %vm76_vm0, %v1315_v58, %v839_v43  ;;  %v518_v46 = vsel %vm76_vm0, %v1322_v48, %v840_v42  ;;  %v309_v58 = vmul.f32 %v1192_v55, %v1192_v55  ;;  %v338_v48 = vsel %vm76_vm0, %v308_v26, 0.0 }
 0x142   :  { %v529_v47 = vpack.c.bf16 %v518_v46, %v517_v1  ;;  %v312_v55 = vmul.f32 %v1218_v24, %v1218_v24  ;;  %v314_v24 = vmul.f32 %v1242_v40, %v1242_v40  ;;  %v359_v40 = vsel %vm76_vm0, %v315_v41, 0.0 }
 0x143   :  { %330 = vadd.xlane.f32.xlu0 %v329_v57  ;;  %v341_v23 = vsel %vm76_vm0, %v309_v58, 0.0 }
 0x144   :  { %800 = vmatprep.mubr.bf16.mxu1 %v529_v47  ;;  %333 = vadd.xlane.f32.xlu1 %v332_v51  ;;  %v350_v52 = vsel %vm76_vm0, %v312_v55, 0.0  ;;  %v356_v22 = vsel %vm76_vm0, %v314_v24, 0.0 }
 0x147   :  { %336 = vadd.xlane.f32.xlu0 %v335_v63 }
 0x148   :  { %339 = vadd.xlane.f32.xlu1 %v338_v48 }
 0x14a   :  { %v843_v54 = vpop.permute.xlu1 %842 }
 0x14b   :  { %v845_v44 = vunpack.i.h.bf16 %v843_v54  ;;  %v844_v37 = vunpack.i.l.bf16 %v843_v54  ;;  %342 = vadd.xlane.f32.xlu0 %v341_v23 }
 0x14c   :  { %345 = vadd.xlane.f32.xlu1 %v344_v10 }
 0x14d   :  { %v511_v36 = vsel %vm76_vm0, %v1275_v19, %v844_v37  ;;  %v512_v9 = vsel %vm76_vm0, %v1281_v61, %v845_v44  ;;  %v353_v19 = vsel %vm76_vm0, %v313_v25, 0.0 }
 0x14e   :  { %v526_v12 = vpack.c.bf16 %v512_v9, %v511_v36  ;;  %v848_v53 = vpop.permute.xlu1 %847 }
 0x14f   :  { %348 = vadd.xlane.f32.xlu0 %v347_v13  ;;  %v850_v4 = vunpack.i.h.bf16 %v848_v53  ;;  %v849_v56 = vunpack.i.l.bf16 %v848_v53 }
 0x150   :  { %793 = vmatmul.mubr.bf16.vlgmr.msra.gmra.mrb[0].mxu0 %v526_v12  ;;  %351 = vadd.xlane.f32.xlu1 %v350_v52 }
 0x151   :  { %v519_v61 = vsel %vm76_vm0, %v1329_v0, %v849_v56  ;;  %v520_v3 = vsel %vm76_vm0, %v1336_v2, %v850_v4  ;;  %v362_v0 = vsel %vm76_vm0, %v316_v31, 0.0 }
 0x152   :  { %v530_v60 = vpack.c.bf16 %v520_v3, %v519_v61 }
 0x153   :  { %354 = vadd.xlane.f32.xlu0 %v353_v19 }
 0x154   :  { %801 = vmatmul.mubr.bf16.vlgmr.msra.gmra.mrb[0].mxu1 %v530_v60  ;;  %357 = vadd.xlane.f32.xlu1 %v356_v22 }
 0x157   :  { %360 = vadd.xlane.f32.xlu0 %v359_v40 }
 0x158   :  { %363 = vadd.xlane.f32.xlu1 %v362_v0 }
 0x15a   :  { %v853_v30 = vpop.permute.xlu0 %852 }
 0x15b   :  { %v855_v2 = vunpack.i.h.bf16 %v853_v30  ;;  %v854_v7 = vunpack.i.l.bf16 %v853_v30 }
 0x15d   :  { %v513_v18 = vsel %vm76_vm0, %v1291_v15, %v854_v7  ;;  %v514_v6 = vsel %vm76_vm0, %v1297_v14, %v855_v2 }
 0x15e   :  { %v527_v5 = vpack.c.bf16 %v514_v6, %v513_v18  ;;  %v858_v33 = vpop.permute.xlu1 %857 }
 0x15f   :  { %v860_v11 = vunpack.i.h.bf16 %v858_v33  ;;  %v859_v39 = vunpack.i.l.bf16 %v858_v33 }
 0x160   :  { %796 = vmatprep.mubr.bf16.mxu0 %v527_v5 }
 0x161   :  { %v521_v59 = vsel %vm76_vm0, %v1343_v21, %v859_v39  ;;  %v522_v38 = vsel %vm76_vm0, %v1350_v20, %v860_v11 }
 0x162   :  { %v531_v32 = vpack.c.bf16 %v522_v38, %v521_v59 }
 0x164   :  { %804 = vmatprep.mubr.bf16.mxu1 %v531_v32 }
 0x16a   :  { %v863_v49 = vpop.permute.xlu0 %862 }
 0x16b   :  { %v865_v17 = vunpack.i.h.bf16 %v863_v49  ;;  %v864_v35 = vunpack.i.l.bf16 %v863_v49 }
 0x16d   :  { %v515_v15 = vsel %vm76_vm0, %v1302_v34, %v864_v35  ;;  %v516_v14 = vsel %vm76_vm0, %v1308_v27, %v865_v17  ;;  %v1482_v35 = vld [vmem:[%s1529_s2] ss:$0 sm:$0xff]  ;;  %s989_s2 = smov [#allocation7]  }
 0x16e   :  { %v528_v42 = vpack.c.bf16 %v516_v14, %v515_v15  ;;  %v868_v43 = vpop.permute.xlu1 %867  ;;  %s738_s13 = sshll.u32 %s989_s2, 4  ;;  %s739_s13 = int_to_ptr.vmem [resolvable:$true] %s738_s13 }
 0x16f   :  { %v870_v50 = vunpack.i.h.bf16 %v868_v43  ;;  %v869_v16 = vunpack.i.l.bf16 %v868_v43  ;;  %s955_s14 = scalar_lea.vmem %s739_s13, 2048  ;;  %p960_p3 = scmp.lt.s32.totalorder %s739_s13, %s739_s13 }
 0x170   :  { %797 = vmatmul.mubr.bf16.gmra.mrb[4].mxu0 %v528_v42  ;;  %p956_p2 = scmp.ne.s32.totalorder %s739_s13, %s955_s14  ;;  %p961_p4 = scmp.lt.s32.totalorder %s955_s14, %s955_s14 }
 0x171   :  { %v523_v21 = vsel %vm76_vm0, %v1356_v62, %v869_v16  ;;  %v524_v20 = vsel %vm76_vm0, %v1362_v28, %v870_v50 }
 0x172   :  { %v532_v57 = vpack.c.bf16 %v524_v20, %v523_v21  ;;  %p962_p5 = por %p961_p4, %p960_p3 }
 0x174   :  { %805 = vmatmul.mubr.bf16.gmra.mrb[4].mxu1 %v532_v57  ;;  %p963_p6 = pnand %p962_p5, %p956_p2 }
 0x1a4   :  { %v255_v1 = vpop.xlane.xlu0 %254 }
 0x1a8   :  { %v261_v46 = vpop.xlane.xlu0 %260 }
 0x1ac   :  { %v264_v29 = vpop.xlane.xlu0 %263 }
 0x1ad   :  { %v258_v34 = vpop.xlane.xlu1 %257 }
 0x1b0   :  { %v1455_v47 = vpop.xlane.xlu0 %266 }
 0x1b1   :  { %v1457_v27 = vpop.xlane.xlu1 %269 }
 0x1b4   :  { %v1459_v51 = vpop.xlane.xlu0 %272 }
 0x1b5   :  { %v1461_v26 = vpop.xlane.xlu1 %275 }
 0x1b8   :  { %v279_v63 = vpop.xlane.xlu0 %278 }
 0x1b9   :  { %v282_v58 = vpop.xlane.xlu1 %281 }
 0x1bc   :  { %v285_v62 = vpop.xlane.xlu0 %284 }
 0x1bd   :  { %v288_v48 = vpop.xlane.xlu1 %287 }
 0x1c0   :  { %v1463_v45 = vpop.xlane.xlu0 %290 }
 0x1c1   :  { %v1465_v28 = vpop.xlane.xlu1 %293 }
 0x1c4   :  { %v1467_v54 = vpop.xlane.xlu0 %296 }
 0x1c5   :  { %v1469_v23 = vpop.xlane.xlu1 %299 }
 0x1c8   :  { %v319_v8 = vpop.xlane.xlu0 %318 }
 0x1c9   :  { %v322_v44 = vpop.xlane.xlu1 %321  ;;  %v365_v4 = vadd.f32 %v319_v8, %v255_v1 }
 0x1ca   :  { %v366_v24 = vadd.f32 %v322_v44, %v258_v34 }
 0x1cb   :  { %v381_v3 = vmul.f32 0.0078125, %v365_v4 }
 0x1cc   :  { %v325_v37 = vpop.xlane.xlu0 %324  ;;  %v382_v31 = vmul.f32 0.0078125, %v366_v24 }
 0x1cd   :  { %v328_v10 = vpop.xlane.xlu1 %327  ;;  %v367_v53 = vadd.f32 %v325_v37, %v261_v46  ;;  %v397_v2 = vadd.f32 1e-05, %v381_v3 }
 0x1ce   :  { %v368_v56 = vadd.f32 %v328_v10, %v264_v29  ;;  %v398_v5 = vadd.f32 1e-05, %v382_v31 }
 0x1cf   :  { %v383_v19 = vmul.f32 0.0078125, %v367_v53 }
 0x1d0   :  { %v1471_v55 = vpop.xlane.xlu0 %330  ;;  %v384_v60 = vmul.f32 0.0078125, %v368_v56 }
 0x1d1   :  { %v1473_v36 = vpop.xlane.xlu1 %333  ;;  %v399_v0 = vadd.f32 1e-05, %v383_v19 }
 0x1d2   :  { %v400_v18 = vadd.f32 1e-05, %v384_v60  ;;  %v369_v60 = vadd.f32 %v1471_v55, %v1455_v47 }
 0x1d3   :  { %879 = vrsqrt.f32 %v399_v0  ;;  %v370_v0 = vadd.f32 %v1473_v36, %v1457_v27 }
 0x1d4   :  { %v1475_v9 = vpop.xlane.xlu0 %336  ;;  %881 = vrsqrt.f32 %v397_v2 }
 0x1d5   :  { %v1477_v13 = vpop.xlane.xlu1 %339  ;;  %883 = vrsqrt.f32 %v400_v18  ;;  %v371_v3 = vadd.f32 %v1475_v9, %v1459_v51  ;;  %v385_v9 = vmul.f32 0.0078125, %v369_v60  ;;  %v386_v55 = vmul.f32 0.0078125, %v370_v0 }
 0x1d6   :  { %885 = vrsqrt.f32 %v398_v5  ;;  %v372_v31 = vadd.f32 %v1477_v13, %v1461_v26 }
 0x1d7   :  { %v401_v13 = vadd.f32 1e-05, %v385_v9  ;;  %v402_v27 = vadd.f32 1e-05, %v386_v55 }
 0x1d8   :  { %v343_v12 = vpop.xlane.xlu0 %342 }
 0x1d9   :  { %v346_v25 = vpop.xlane.xlu1 %345  ;;  %v373_v22 = vadd.f32 %v343_v12, %v279_v63 }
 0x1da   :  { %v374_v30 = vadd.f32 %v346_v25, %v282_v58 }
 0x1db   :  { %v389_v6 = vmul.f32 0.0078125, %v373_v22 }
 0x1dc   :  { %v349_v52 = vpop.xlane.xlu0 %348  ;;  %v390_v11 = vmul.f32 0.0078125, %v374_v30  ;;  %v387_v30 = vmul.f32 0.0078125, %v371_v3 }
 0x1dd   :  { %v352_v61 = vpop.xlane.xlu1 %351  ;;  %v375_v41 = vadd.f32 %v349_v52, %v285_v62  ;;  %v405_v59 = vadd.f32 1e-05, %v389_v6  ;;  %v880_v49 = vpop.eup %879 }
 0x1de   :  { %v376_v40 = vadd.f32 %v352_v61, %v288_v48  ;;  %v406_v32 = vadd.f32 1e-05, %v390_v11  ;;  %v882_v15 = vpop.eup %881  ;;  %v403_v6 = vadd.f32 1e-05, %v387_v30 }
 0x1df   :  { %v391_v7 = vmul.f32 0.0078125, %v375_v41  ;;  %v884_v43 = vpop.eup %883 }
 0x1e0   :  { %v392_v33 = vmul.f32 0.0078125, %v376_v40  ;;  %v886_v21 = vpop.eup %885  ;;  %v355_v48 = vpop.xlane.xlu0 %354 }
 0x1e1   :  { %v407_v39 = vadd.f32 1e-05, %v391_v7  ;;  %v358_v4 = vpop.xlane.xlu1 %357  ;;  %v388_v7 = vmul.f32 0.0078125, %v372_v31  ;;  %v377_v47 = vadd.f32 %v355_v48, %v1463_v45 }
 0x1e2   :  { %v408_v38 = vadd.f32 1e-05, %v392_v33  ;;  %v378_v26 = vadd.f32 %v358_v4, %v1465_v28 }
 0x1e3   :  { %887 = vrsqrt.f32 %v407_v39  ;;  %v404_v33 = vadd.f32 1e-05, %v388_v7  ;;  %v393_v11 = vmul.f32 0.0078125, %v377_v47 }
 0x1e4   :  { %889 = vrsqrt.f32 %v405_v59  ;;  %v361_v40 = vpop.xlane.xlu0 %360  ;;  %v394_v39 = vmul.f32 0.0078125, %v378_v26 }
 0x1e5   :  { %891 = vrsqrt.f32 %v408_v38  ;;  %v364_v51 = vpop.xlane.xlu1 %363  ;;  %v379_v2 = vadd.f32 %v361_v40, %v1467_v54  ;;  %v409_v54 = vadd.f32 1e-05, %v393_v11 }
 0x1e6   :  { %893 = vrsqrt.f32 %v406_v32  ;;  %v380_v18 = vadd.f32 %v364_v51, %v1469_v23  ;;  %v410_v38 = vadd.f32 1e-05, %v394_v39 }
 0x1e7   :  { %v395_v5 = vmul.f32 0.0078125, %v379_v2  ;;  %895 = vrsqrt.f32 %v403_v6 }
 0x1e8   :  { %v396_v36 = vmul.f32 0.0078125, %v380_v18  ;;  %897 = vrsqrt.f32 %v401_v13 }
 0x1e9   :  { %v411_v59 = vadd.f32 1e-05, %v395_v5  ;;  %899 = vrsqrt.f32 %v404_v33 }
 0x1ea   :  { %901 = vrsqrt.f32 %v402_v27  ;;  %v412_v45 = vadd.f32 1e-05, %v396_v36 }
 0x1eb   :  { %903 = vrsqrt.f32 %v411_v59 }
 0x1ec   :  { %905 = vrsqrt.f32 %v409_v54 }
 0x1ed   :  { %v888_v34 = vpop.eup %887  ;;  %907 = vrsqrt.f32 %v412_v45 }
 0x1ee   :  { %v890_v62 = vpop.eup %889  ;;  %909 = vrsqrt.f32 %v410_v38 }
 0x1ef   :  { %v892_v10 = vpop.eup %891 }
 0x1f0   :  { %v894_v53 = vpop.eup %893 }
 0x1f1   :  { %v896_v28 = vpop.eup %895 }
 0x1f2   :  { %v898_v32 = vpop.eup %897 }
 0x223   :  { %v794_v17 = vpop.f32.mrb[0].mxu0 }
 0x224   :  { %v680_v14 = vmul.f32 %v880_v49, %v794_v17  ;;  %v615_v42 = vpop.f32.mrb[1].mxu0 }
 0x225   :  { %v678_v50 = vmul.f32 %v882_v15, %v615_v42  ;;  %v795_v16 = vpop.f32.mrb[2].mxu0  ;;  %v900_v15 = vpop.eup %899 }
 0x226   :  { %v703_v20 = vadd.f32 %v1482_v35, %v680_v14  ;;  %v681_v57 = vmul.f32 %v884_v43, %v795_v16  ;;  %v618_v1 = vpop.f32.mrb[3].mxu0  ;;  %v902_v43 = vpop.eup %901 }
 0x227   :  { %v701_v46 = vadd.f32 %v1482_v35, %v678_v50  ;;  %v679_v29 = vmul.f32 %v886_v21, %v618_v1  ;;  %v802_v58 = vpop.f32.mrb[0].mxu1  ;;  %v904_v1 = vpop.eup %903 }
 0x228   :  { %719 = vst [vmem:[#allocation7 + $0x10] sm:$0xff] %v703_v20  ;;  %v704_v63 = vadd.f32 %v1482_v35, %v681_v57  ;;  %v688_v44 = vmul.f32 %v888_v34, %v802_v58  ;;  %v647_v37 = vpop.f32.mrb[1].mxu1  ;;  %v906_v34 = vpop.eup %905 }
 0x229   :  { %717 = vst [vmem:[#allocation7] sm:$0xff] %v701_v46  ;;  %v702_v8 = vadd.f32 %v1482_v35, %v679_v29  ;;  %v686_v12 = vmul.f32 %v890_v62, %v647_v37  ;;  %v803_v25 = vpop.f32.mrb[2].mxu1  ;;  %v908_v48 = vpop.eup %907 }
 0x22a   :  { %720 = vst [vmem:[#allocation7 + $0x18] sm:$0xff] %v704_v63  ;;  %v711_v56 = vadd.f32 %v1482_v35, %v688_v44  ;;  %v689_v52 = vmul.f32 %v892_v10, %v803_v25  ;;  %v650_v24 = vpop.f32.mrb[3].mxu1  ;;  %v910_v37 = vpop.eup %909 }
 0x22b   :  { %718 = vst [vmem:[#allocation7 + $0x8] sm:$0xff] %v702_v8  ;;  %v709_v19 = vadd.f32 %v1482_v35, %v686_v12  ;;  %v687_v61 = vmul.f32 %v894_v53, %v650_v24 }
 0x22c   :  { %727 = vst [vmem:[#allocation7 + $0x50] sm:$0xff] %v711_v56  ;;  %v712_v41 = vadd.f32 %v1482_v35, %v689_v52 }
 0x22d   :  { %725 = vst [vmem:[#allocation7 + $0x40] sm:$0xff] %v709_v19  ;;  %v710_v22 = vadd.f32 %v1482_v35, %v687_v61 }
 0x22e   :  { %728 = vst [vmem:[#allocation7 + $0x58] sm:$0xff] %v712_v41 }
 0x22f   :  { %726 = vst [vmem:[#allocation7 + $0x48] sm:$0xff] %v710_v22 }
 0x243   :  { %v798_v23 = vpop.f32.mrb[4].mxu0 }
 0x244   :  { %v684_v49 = vmul.f32 %v896_v28, %v798_v23  ;;  %v631_v17 = vpop.f32.mrb[5].mxu0 }
 0x245   :  { %v682_v14 = vmul.f32 %v898_v32, %v631_v17  ;;  %v799_v42 = vpop.f32.mrb[6].mxu0 }
 0x246   :  { %v707_v50 = vadd.f32 %v1482_v35, %v684_v49  ;;  %v685_v16 = vmul.f32 %v900_v15, %v799_v42  ;;  %v634_v21 = vpop.f32.mrb[7].mxu0 }
 0x247   :  { %v705_v20 = vadd.f32 %v1482_v35, %v682_v14  ;;  %v683_v57 = vmul.f32 %v902_v43, %v634_v21  ;;  %v806_v29 = vpop.f32.mrb[4].mxu1 }
 0x248   :  { %723 = vst [vmem:[#allocation7 + $0x30] sm:$0xff] %v707_v50  ;;  %v708_v46 = vadd.f32 %v1482_v35, %v685_v16  ;;  %v692_v58 = vmul.f32 %v904_v1, %v806_v29  ;;  %v663_v62 = vpop.f32.mrb[5].mxu1 }
 0x249   :  { %721 = vst [vmem:[#allocation7 + $0x20] sm:$0xff] %v705_v20  ;;  %v706_v63 = vadd.f32 %v1482_v35, %v683_v57  ;;  %v690_v8 = vmul.f32 %v906_v34, %v663_v62  ;;  %v807_v44 = vpop.f32.mrb[6].mxu1 }
 0x24a   :  { %724 = vst [vmem:[#allocation7 + $0x38] sm:$0xff] %v708_v46  ;;  %v715_v10 = vadd.f32 %v1482_v35, %v692_v58  ;;  %v693_v12 = vmul.f32 %v908_v48, %v807_v44  ;;  %v666_v25 = vpop.f32.mrb[7].mxu1 }
 0x24b   :  { %722 = vst [vmem:[#allocation7 + $0x28] sm:$0xff] %v706_v63  ;;  %v713_v53 = vadd.f32 %v1482_v35, %v690_v8  ;;  %v691_v4 = vmul.f32 %v910_v37, %v666_v25 }
 0x24c   :  { %731 = vst [vmem:[#allocation7 + $0x70] sm:$0xff] %v715_v10  ;;  %v716_v56 = vadd.f32 %v1482_v35, %v693_v12 }
 0x24d   :  { %729 = vst [vmem:[#allocation7 + $0x60] sm:$0xff] %v713_v53  ;;  %v714_v52 = vadd.f32 %v1482_v35, %v691_v4 }
 0x24e   :  { %732 = vst [vmem:[#allocation7 + $0x78] sm:$0xff] %v716_v56 }
 0x24f   :  { %730 = vst [vmem:[#allocation7 + $0x68] sm:$0xff] %v714_v52 }
 0x250   :  { %966 = shalt.err (!%p963_p6)
}
 0x251   :  { %s967_s17 = scalar_lea.hbm %s1530_s3, 2048 }
 0x252   :  { %p968_p7 = scmp.ne.s32.totalorder %s1530_s3, %s967_s17  ;;  %p971_p8 = scmp.lt.u32.totalorder %s967_s17, %s1530_s3 }
 0x254   :  { %p973_p9 = pnand %p971_p8, %p968_p7 }
 0x256   :  { %976 = shalt.err (!%p973_p9)
}
 0x257   :  { %744 = dma.vmem_to_hbm [thread:$0]  %s739_s13, 2048, %s1530_s3, [#allocation4], %s984_s22, %s984_s22, %s985_s23  }
 0x258   :  { %981 = dma.done.wait [#allocation4], 2048  }
 0x259   :  { %982 = vsyncadd [#allocation4], 4294965248 }
 0x25a   :  { %748 = vsyncpa [#allocation3], 1 }
 0x25b   :  { %749 = vsyncpa [#allocation6], 1 }
 0x25c   :  { %750 = vsyncpa [#allocation4], 1 }

</bundles_post_ra>
